<compile_context>
chip_gen: v6e
topology: v6e:2x2x1
jax: 0.10.0
libtpu: 0.0.40
codegen_flags: <defaults>
</compile_context>

<pallas_src>
from functools import partial

import jax
import jax.numpy as jnp
from jax import lax
from jax.experimental import pallas as pl
from jax.experimental.pallas import tpu as pltpu


# ----------------------------- helpers ------------------------------------- #

def _round_up(x, m):
    return ((x + m - 1) // m) * m


def _pad_nodes(n):
    """Pad a node count so it is lane-dense (x128) and tile-friendly."""
    n = max(int(n), 1)
    if n <= 1024:
        return _round_up(n, 128)
    return _round_up(n, 1024)          # divisible by 512 row / 1024 reduction tiles


def _largest_tile(n_pad, cap):
    """Largest multiple of 128 <= cap that divides n_pad (n_pad is x128)."""
    t = max(128, (min(cap, n_pad) // 128) * 128)
    while n_pad % t:
        t -= 128
    return t


def _row_tile(n_pad):
    t = _largest_tile(n_pad, 512)
    # Keep >= 2 steps on the 'parallel' row axis when possible (v7x: 2 TCs).
    if n_pad // t < 2 and n_pad >= 256:
        t = _largest_tile(n_pad, n_pad // 2)
    return t


def _red_tile(n_pad):
    return _largest_tile(n_pad, 1024)


def _vmem_budget_bytes():
    """Generation-aware VMEM budget (v5e/v6e: 128 MiB, v7x: 64 MiB per TC)."""
    try:
        cap = int(pltpu.get_tpu_info().vmem_capacity_bytes)
    except Exception:
        cap = 0
    if cap >= 128 * 1024 * 1024:
        return 100 * 1024 * 1024                     # v5e / v6e
    if cap > 0:
        return max(32 * 1024 * 1024, int(cap * 0.6))  # v7x: ~38 MiB of 64 MiB
    return 48 * 1024 * 1024                          # unknown backend: conservative


# --------------------- fused path: R resident in VMEM ----------------------- #

def _fused_forward(R, u0, i0, n_layers, vmem_budget):
    """All layers in one pallas_call. R, ego, layer-sum stay in VMEM (f32)."""
    U_pad, I_pad = R.shape
    D_pad = u0.shape[1]

    def kernel(r_ref, u_ref, i_ref, uo_ref, io_ref):
        Rm = r_ref[...]
        u = u_ref[...]
        i = i_ref[...]
        acc_u = u
        acc_i = i
        for _ in range(n_layers):                    # static, small trip count
            u_next = jnp.dot(Rm, i, preferred_element_type=jnp.float32)
            # i' = R^T @ u : contract leading dims — no transpose materialized.
            i_next = lax.dot_general(Rm, u, (((0,), (0,)), ((), ())),
                                     preferred_element_type=jnp.float32)
            u, i = u_next, i_next
            acc_u = acc_u + u
            acc_i = acc_i + i
        scale = 1.0 / float(n_layers + 1)
        uo_ref[...] = acc_u * scale
        io_ref[...] = acc_i * scale

    flops = 2 * 2 * U_pad * I_pad * D_pad * n_layers
    bytes_accessed = (U_pad * I_pad + 2 * (U_pad + I_pad) * D_pad) * 4
    return pl.pallas_call(
        kernel,
        out_shape=(jax.ShapeDtypeStruct((U_pad, D_pad), jnp.float32),
                   jax.ShapeDtypeStruct((I_pad, D_pad), jnp.float32)),
        compiler_params=pltpu.CompilerParams(vmem_limit_bytes=vmem_budget),
        cost_estimate=pl.CostEstimate(flops=flops, transcendentals=0,
                                      bytes_accessed=bytes_accessed),
    )(R, u0, i0)


# ------------------ streaming path: tiled matmul + accumulate --------------- #

def _make_user_mm(U_pad, I_pad, D_pad, tm, tk, vmem_budget):
    """(R[U,I] bf16, X[I,D] f32, acc_in[U,D] f32) -> (Y = R@X, acc_in + Y)."""
    grid = (U_pad // tm, I_pad // tk)

    def kernel(a_ref, x_ref, acc_in_ref, y_ref, acc_out_ref, acc_sc):
        @pl.when(pl.program_id(1) == 0)
        def _():
            acc_sc[...] = jnp.zeros_like(acc_sc)

        a = a_ref[...].astype(jnp.float32)          # bf16 HBM stream, f32 matmul
        acc_sc[...] += jnp.dot(a, x_ref[...], preferred_element_type=jnp.float32)

        @pl.when(pl.program_id(1) == pl.num_programs(1) - 1)
        def _():
            y = acc_sc[...]
            y_ref[...] = y                          # next-layer ego (f32)
            acc_out_ref[...] = acc_in_ref[...] + y  # running layer sum (f32)

    flops = 2 * U_pad * I_pad * D_pad
    bytes_accessed = (U_pad * I_pad * 2
                      + I_pad * D_pad * 4 * (U_pad // tm)
                      + U_pad * D_pad * 4 * 3)
    return pl.pallas_call(
        kernel,
        out_shape=(jax.ShapeDtypeStruct((U_pad, D_pad), jnp.float32),
                   jax.ShapeDtypeStruct((U_pad, D_pad), jnp.float32)),
        grid=grid,
        in_specs=[
            pl.BlockSpec((tm, tk), lambda i, k: (i, k)),
            pl.BlockSpec((tk, D_pad), lambda i, k: (k, 0)),
            pl.BlockSpec((tm, D_pad), lambda i, k: (i, 0)),
        ],
        out_specs=(
            pl.BlockSpec((tm, D_pad), lambda i, k: (i, 0)),
            pl.BlockSpec((tm, D_pad), lambda i, k: (i, 0)),
        ),
        scratch_shapes=[pltpu.VMEM((tm, D_pad), jnp.float32)],
        input_output_aliases={2: 1},                  # acc_in -> acc_out
        compiler_params=pltpu.CompilerParams(
            dimension_semantics=("parallel", "arbitrary"),
            vmem_limit_bytes=vmem_budget),
        cost_estimate=pl.CostEstimate(flops=flops, transcendentals=0,
                                      bytes_accessed=bytes_accessed),
    )


def _make_item_mm(U_pad, I_pad, D_pad, tm, tk, vmem_budget):
    """(R[U,I] bf16, X[U,D] f32, acc_in[I,D] f32) -> (Y = R^T@X, acc_in + Y).
    Reads (tk, tm) blocks of the ORIGINAL R — no R^T materialized in HBM."""
    grid = (I_pad // tm, U_pad // tk)

    def kernel(a_ref, x_ref, acc_in_ref, y_ref, acc_out_ref, acc_sc):
        @pl.when(pl.program_id(1) == 0)
        def _():
            acc_sc[...] = jnp.zeros_like(acc_sc)

        a = a_ref[...].astype(jnp.float32)           # (tk, tm) block of R
        # Contract leading dims: (R block)^T @ (X block) without a transpose copy.
        acc_sc[...] += lax.dot_general(a, x_ref[...], (((0,), (0,)), ((), ())),
                                       preferred_element_type=jnp.float32)

        @pl.when(pl.program_id(1) == pl.num_programs(1) - 1)
        def _():
            y = acc_sc[...]
            y_ref[...] = y
            acc_out_ref[...] = acc_in_ref[...] + y

    flops = 2 * U_pad * I_pad * D_pad
    bytes_accessed = (U_pad * I_pad * 2
                      + U_pad * D_pad * 4 * (I_pad // tm)
                      + I_pad * D_pad * 4 * 3)
    return pl.pallas_call(
        kernel,
        out_shape=(jax.ShapeDtypeStruct((I_pad, D_pad), jnp.float32),
                   jax.ShapeDtypeStruct((I_pad, D_pad), jnp.float32)),
        grid=grid,
        in_specs=[
            pl.BlockSpec((tk, tm), lambda j, k: (k, j)),
            pl.BlockSpec((tk, D_pad), lambda j, k: (k, 0)),
            pl.BlockSpec((tm, D_pad), lambda j, k: (j, 0)),
        ],
        out_specs=(
            pl.BlockSpec((tm, D_pad), lambda j, k: (j, 0)),
            pl.BlockSpec((tm, D_pad), lambda j, k: (j, 0)),
        ),
        scratch_shapes=[pltpu.VMEM((tm, D_pad), jnp.float32)],
        input_output_aliases={2: 1},
        compiler_params=pltpu.CompilerParams(
            dimension_semantics=("parallel", "arbitrary"),
            vmem_limit_bytes=vmem_budget),
        cost_estimate=pl.CostEstimate(flops=flops, transcendentals=0,
                                      bytes_accessed=bytes_accessed),
    )


def _streaming_forward(R_bf, u0, i0, n_layers, vmem_budget):
    U_pad, I_pad = R_bf.shape
    D_pad = u0.shape[1]
    mm_user = _make_user_mm(U_pad, I_pad, D_pad,
                            _row_tile(U_pad), _red_tile(I_pad), vmem_budget)
    mm_item = _make_item_mm(U_pad, I_pad, D_pad,
                            _row_tile(I_pad), _red_tile(U_pad), vmem_budget)

    u_cur, i_cur = u0, i0
    acc_u, acc_i = u0, i0                            # layer-0 contribution (f32)
    for _ in range(n_layers):
        u_next, acc_u = mm_user(R_bf, i_cur, acc_u)  # u' = R_hat   @ i
        i_next, acc_i = mm_item(R_bf, u_cur, acc_i)  # i' = R_hat^T @ u
        u_cur, i_cur = u_next, i_next

    scale = 1.0 / float(n_layers + 1)
    return acc_u * scale, acc_i * scale


# ------------------------------ forward pass -------------------------------- #

@partial(jax.jit, static_argnames=("n_layers", "force_streaming"))
def lgcn_encoder_forward(r_hat, user_emb, item_emb, n_layers,
                         force_streaming=False):
    """r_hat: [n_user, n_item] normalized bipartite adjacency block (f32).
       user_emb: [n_user, D]; item_emb: [n_item, D]."""
    n_user, n_item = r_hat.shape
    D = user_emb.shape[1]
    U_pad, I_pad = _pad_nodes(n_user), _pad_nodes(n_item)
    D_pad = _round_up(D, 128)                         # lane-dense outputs

    # Zero padding is numerically exact: padded rows/cols of R_hat are zero and
    # padded embedding rows/cols stay zero through every layer.
    u0 = jnp.zeros((U_pad, D_pad), jnp.float32).at[:n_user, :D].set(
        user_emb.astype(jnp.float32))
    i0 = jnp.zeros((I_pad, D_pad), jnp.float32).at[:n_item, :D].set(
        item_emb.astype(jnp.float32))
    R = jnp.zeros((U_pad, I_pad), jnp.float32).at[:n_user, :n_item].set(
        r_hat.astype(jnp.float32))

    budget = _vmem_budget_bytes()
    # Resident-R estimate: R (f32) + a handful of live ego/acc copies.
    fused_bytes = U_pad * I_pad * 4 + 6 * (U_pad + I_pad) * D_pad * 4
    if (not force_streaming) and fused_bytes <= int(budget * 0.7):
        acc_u, acc_i = _fused_forward(R, u0, i0, n_layers, budget)
    else:
        acc_u, acc_i = _streaming_forward(R.astype(jnp.bfloat16), u0, i0,
                                          n_layers, budget)

    return acc_u[:n_user, :D], acc_i[:n_item, :D]


# ------------------------------ demo inputs --------------------------------- #

def xavier_uniform(key, shape):
    fan_in, fan_out = shape[0], shape[1]
    limit = (6.0 / (fan_in + fan_out)) ** 0.5
    return jax.random.uniform(key, shape, jnp.float32, -limit, limit)


def build_norm_bipartite(key, n_user, n_item):
    """R_hat = D_u^-1/2 R D_i^-1/2 — the only nonzero block of the LightGCN adj."""
    R = (jax.random.uniform(key, (n_user, n_item)) < 0.3).astype(jnp.float32)
    du = jnp.sum(R, axis=1)
    di = jnp.sum(R, axis=0)
    du_is = jnp.where(du > 0, 1.0 / jnp.sqrt(jnp.maximum(du, 1e-12)), 0.0)
    di_is = jnp.where(di > 0, 1.0 / jnp.sqrt(jnp.maximum(di, 1e-12)), 0.0)
    return R * du_is[:, None] * di_is[None, :]


if __name__ == "__main__":
    key = jax.random.PRNGKey(0)
    k_adj, k_user, k_item = jax.random.split(key, 3)

    n_user, n_item, emb_size, n_layers = 6, 10, 32, 3

    r_hat = build_norm_bipartite(k_adj, n_user, n_item)          # [6, 10]
    user_emb = xavier_uniform(k_user, (n_user, emb_size))        # [6, 32]
    item_emb = xavier_uniform(k_item, (n_item, emb_size))        # [10, 32]

    # Plain-JAX f32 reference: same dense [N,N] propagation as the PyTorch module.
    N = n_user + n_item
    adj = jnp.zeros((N, N), jnp.float32)
    adj = adj.at[:n_user, n_user:].set(r_hat)
    adj = adj.at[n_user:, :n_user].set(r_hat.T)
    ego = jnp.concatenate([user_emb, item_emb], axis=0)
    embs = [ego]
    for _ in range(n_layers):
        ego = adj @ ego
        embs.append(ego)
    ref = jnp.mean(jnp.stack(embs, axis=1), axis=1)
    ref_u, ref_i = ref[:n_user], ref[n_user:]

    # Fused (resident-R, all layers in one pallas_call) path — f32 end to end.
    u_f, i_f = lgcn_encoder_forward(r_hat, user_emb, item_emb, n_layers=n_layers)
    jax.block_until_ready((u_f, i_f))
    assert jnp.allclose(u_f, ref_u, atol=1e-4, rtol=1e-4), \
        float(jnp.max(jnp.abs(u_f - ref_u)))
    assert jnp.allclose(i_f, ref_i, atol=1e-4, rtol=1e-4), \
        float(jnp.max(jnp.abs(i_f - ref_i)))

    # Streaming (tiled) path — bf16 adjacency stream, f32 ego/accumulators.
    u_s, i_s = lgcn_encoder_forward(r_hat, user_emb, item_emb, n_layers=n_layers,
                                    force_streaming=True)
    jax.block_until_ready((u_s, i_s))
    assert jnp.allclose(u_s, ref_u, atol=2e-2, rtol=2e-2), \
        float(jnp.max(jnp.abs(u_s - ref_u)))
    assert jnp.allclose(i_s, ref_i, atol=2e-2, rtol=2e-2), \
        float(jnp.max(jnp.abs(i_s - ref_i)))

    print("KERNEL_OK")
</pallas_src>

<mosaic_0001>
module attributes {stable_mosaic.version = 11 : i64} {
  func.func @kernel(%arg0: memref<128x128xf32, #tpu.memory_space<vmem>>, %arg1: memref<128x128xf32, #tpu.memory_space<vmem>>, %arg2: memref<128x128xf32, #tpu.memory_space<vmem>>, %arg3: memref<128x128xf32, #tpu.memory_space<vmem>>, %arg4: memref<128x128xf32, #tpu.memory_space<vmem>>) attributes {dimension_semantics = [], scalar_prefetch = 0 : i64, scratch_operands = 0 : i64, tpu.core_type = #tpu.core_type<tc>} {
    %c0 = arith.constant 0 : index
    %c0_0 = arith.constant 0 : index
    %0 = vector.load %arg0[%c0, %c0_0] : memref<128x128xf32, #tpu.memory_space<vmem>>, vector<128x128xf32>
    %c0_1 = arith.constant 0 : index
    %c0_2 = arith.constant 0 : index
    %1 = vector.load %arg1[%c0_1, %c0_2] : memref<128x128xf32, #tpu.memory_space<vmem>>, vector<128x128xf32>
    %c0_3 = arith.constant 0 : index
    %c0_4 = arith.constant 0 : index
    %2 = vector.load %arg2[%c0_3, %c0_4] : memref<128x128xf32, #tpu.memory_space<vmem>>, vector<128x128xf32>
    %cst = arith.constant dense<0.000000e+00> : vector<128x128xf32>
    %3 = tpu.matmul %0, %2, %cst {dimension_numbers = #tpu.dot_dimension_numbers<[1], [0], [0], [1], [0, 0, 1, 1], [], []>} : vector<128x128xf32>, vector<128x128xf32>, vector<128x128xf32> -> vector<128x128xf32>
    %cst_5 = arith.constant dense<0.000000e+00> : vector<128x128xf32>
    %4 = tpu.matmul %0, %1, %cst_5 {dimension_numbers = #tpu.dot_dimension_numbers<[0], [0], [1], [1], [0, 1, 1, 1], [], []>} : vector<128x128xf32>, vector<128x128xf32>, vector<128x128xf32> -> vector<128x128xf32>
    %5 = arith.addf %1, %3 : vector<128x128xf32>
    %6 = arith.addf %2, %4 : vector<128x128xf32>
    %cst_6 = arith.constant dense<0.000000e+00> : vector<128x128xf32>
    %7 = tpu.matmul %0, %4, %cst_6 {dimension_numbers = #tpu.dot_dimension_numbers<[1], [0], [0], [1], [0, 0, 1, 1], [], []>} : vector<128x128xf32>, vector<128x128xf32>, vector<128x128xf32> -> vector<128x128xf32>
    %cst_7 = arith.constant dense<0.000000e+00> : vector<128x128xf32>
    %8 = tpu.matmul %0, %3, %cst_7 {dimension_numbers = #tpu.dot_dimension_numbers<[0], [0], [1], [1], [0, 1, 1, 1], [], []>} : vector<128x128xf32>, vector<128x128xf32>, vector<128x128xf32> -> vector<128x128xf32>
    %9 = arith.addf %5, %7 : vector<128x128xf32>
    %10 = arith.addf %6, %8 : vector<128x128xf32>
    %cst_8 = arith.constant dense<0.000000e+00> : vector<128x128xf32>
    %11 = tpu.matmul %0, %8, %cst_8 {dimension_numbers = #tpu.dot_dimension_numbers<[1], [0], [0], [1], [0, 0, 1, 1], [], []>} : vector<128x128xf32>, vector<128x128xf32>, vector<128x128xf32> -> vector<128x128xf32>
    %cst_9 = arith.constant dense<0.000000e+00> : vector<128x128xf32>
    %12 = tpu.matmul %0, %7, %cst_9 {dimension_numbers = #tpu.dot_dimension_numbers<[0], [0], [1], [1], [0, 1, 1, 1], [], []>} : vector<128x128xf32>, vector<128x128xf32>, vector<128x128xf32> -> vector<128x128xf32>
    %13 = arith.addf %9, %11 : vector<128x128xf32>
    %14 = arith.addf %10, %12 : vector<128x128xf32>
    %cst_10 = arith.constant 2.500000e-01 : f32
    %15 = vector.broadcast %cst_10 : f32 to vector<128x128xf32>
    %16 = arith.mulf %13, %15 : vector<128x128xf32>
    %c0_11 = arith.constant 0 : index
    %c0_12 = arith.constant 0 : index
    %17 = vector.load %arg3[%c0_11, %c0_12] : memref<128x128xf32, #tpu.memory_space<vmem>>, vector<128x128xf32>
    tpu.vector_store %arg3[%c0_11, %c0_12], %16 {strides = array<i32>} : memref<128x128xf32, #tpu.memory_space<vmem>>, vector<128x128xf32>,
    %cst_13 = arith.constant 2.500000e-01 : f32
    %18 = vector.broadcast %cst_13 : f32 to vector<128x128xf32>
    %19 = arith.mulf %14, %18 : vector<128x128xf32>
    %c0_14 = arith.constant 0 : index
    %c0_15 = arith.constant 0 : index
    %20 = vector.load %arg4[%c0_14, %c0_15] : memref<128x128xf32, #tpu.memory_space<vmem>>, vector<128x128xf32>
    tpu.vector_store %arg4[%c0_14, %c0_15], %19 {strides = array<i32>} : memref<128x128xf32, #tpu.memory_space<vmem>>, vector<128x128xf32>,
    return
  }
}

</mosaic_0001>

<bundles_post_ra>
// kernel: lgcn_encoder_forward.1
= control target key start
LH: loop header
LB: loop body
LE: loop exit
PB: predicated region body
PF: predicated region fallthrough
CT: control target
= control target key end

     0   :  { %s2545_s2 = inlined_call_operand.vmem [shape: f32[128,128], index: 2, kind: input, shape index: {}]   ;;  %s2546_s0 = inlined_call_operand.vmem [shape: f32[128,128], index: 0, kind: input, shape index: {}]   ;;  %s2547_s1 = inlined_call_operand.vmem [shape: f32[128,128], index: 1, kind: input, shape index: {}]   ;;  %s2548_s3 = inlined_call_operand.vmem [shape: f32[128,128], index: 3, kind: output, shape index: {0}]   ;;  %s2549_s4 = inlined_call_operand.vmem [shape: f32[128,128], index: 4, kind: output, shape index: {1}]  }
   0x1   :  { %v1691_v0 = vld [vmem:[%s2545_s2 + $0x78] sm:$0xff]  ;;  %v1696_v1 = vld [vmem:[%s2546_s0] sm:$0xff]  ;;  %v62_v2 = vld [vmem:[%s2545_s2 + $0x70] sm:$0xff] }
   0x2   :  { %1326 = vmatprep.subr.mxu0 %v1691_v0  ;;  %209 = vxpose.xlu0.b32.start [1/16] %v1696_v1, 128  ;;  %v1707_v3 = vld [vmem:[%s2545_s2 + $0x68] sm:$0xff]  ;;  %v1718_v5 = vld [vmem:[%s2545_s2 + $0x60] sm:$0xff]  ;;  %v1726_v6 = vld [vmem:[%s2545_s2 + $0x58] sm:$0xff] }
   0x3   :  { %1327 = vmatpush3.msra.mxu0 %v1691_v0  ;;  %v1712_v4 = vld [vmem:[%s2546_s0 + $0x8] sm:$0xff]  ;;  %1358 = vmatprep.mubr.f32.mxu0 %v1696_v1  ;;  %v1731_v7 = vld [vmem:[%s2546_s0 + $0x10] sm:$0xff]  ;;  %v1751_v10 = vld [vmem:[%s2546_s0 + $0x18] sm:$0xff] }
   0x4   :  { %1328 = vmatprep.subr.mxu0 %v62_v2  ;;  %v1738_v8 = vld [vmem:[%s2545_s2 + $0x50] sm:$0xff]  ;;  %v1746_v9 = vld [vmem:[%s2545_s2 + $0x48] sm:$0xff]  ;;  %v1756_v11 = vld [vmem:[%s2547_s1 + $0x78] sm:$0xff] }
   0x5   :  { %1329 = vmatpush3.msra.mxu0 %v62_v2  ;;  %2594 = vst [vmem:[#allocation2_spill] sm:$0xff] %v1756_v11  ;;  %1382 = vmatprep.subr.mxu1 %v1756_v11  ;;  %v1763_v12 = vld [vmem:[%s2547_s1 + $0x70] sm:$0xff]  ;;  %v1769_v13 = vld [vmem:[%s2545_s2 + $0x40] sm:$0xff]  ;;  %v1777_v14 = vld [vmem:[%s2547_s1 + $0x68] sm:$0xff] }
   0x6   :  { %1330 = vmatprep.subr.mxu0 %v1707_v3  ;;  %210 = vxpose.xlu0.b32.cont [2/16] %v1712_v4, 128  ;;  %2595 = vst [vmem:[#allocation3_spill] sm:$0xff] %v1763_v12  ;;  %2596 = vst [vmem:[#allocation4_spill] sm:$0xff] %v1777_v14  ;;  %v1783_v15 = vld [vmem:[%s2545_s2 + $0x38] sm:$0xff]  ;;  %v1788_v16 = vld [vmem:[%s2546_s0 + $0x20] sm:$0xff] }
   0x7   :  { %1331 = vmatpush3.msra.mxu0 %v1707_v3  ;;  %1383 = vmatpush3.msra.mxu1 %v1756_v11  ;;  %v1797_v17 = vld [vmem:[%s2545_s2 + $0x30] sm:$0xff]  ;;  %v1803_v18 = vld [vmem:[%s2547_s1 + $0x60] sm:$0xff]  ;;  %v1811_v19 = vld [vmem:[%s2545_s2 + $0x28] sm:$0xff] }
   0x8   :  { %1332 = vmatprep.subr.mxu0 %v1718_v5  ;;  %1384 = vmatprep.subr.mxu1 %v1763_v12  ;;  %2597 = vst [vmem:[#allocation5_spill] sm:$0xff] %v1803_v18  ;;  %v1816_v20 = vld [vmem:[%s2546_s0 + $0x28] sm:$0xff]  ;;  %v1824_v21 = vld [vmem:[%s2547_s1 + $0x58] sm:$0xff]  ;;  %v1830_v22 = vld [vmem:[%s2545_s2 + $0x20] sm:$0xff] }
   0x9   :  { %1333 = vmatpush3.msra.mxu0 %v1718_v5  ;;  %1385 = vmatpush3.msra.mxu1 %v1763_v12  ;;  %2598 = vst [vmem:[#allocation6_spill] sm:$0xff] %v1824_v21  ;;  %v1838_v23 = vld [vmem:[%s2547_s1 + $0x50] sm:$0xff]  ;;  %v1844_v24 = vld [vmem:[%s2545_s2 + $0x18] sm:$0xff]  ;;  %v1864_v27 = vld [vmem:[%s2547_s1 + $0x48] sm:$0xff] }
   0xa   :  { %1334 = vmatprep.subr.mxu0 %v1726_v6  ;;  %211 = vxpose.xlu0.b32.cont [3/16] %v1731_v7, 128  ;;  %2599 = vst [vmem:[#allocation7_spill] sm:$0xff] %v1838_v23  ;;  %2600 = vst [vmem:[#allocation8_spill] sm:$0xff] %v1844_v24  ;;  %v1849_v25 = vld [vmem:[%s2546_s0 + $0x30] sm:$0xff]  ;;  %v1872_v28 = vld [vmem:[%s2545_s2 + $0x8] sm:$0xff] }
   0xb   :  { %1335 = vmatpush3.msra.mxu0 %v1726_v6  ;;  %1386 = vmatprep.subr.mxu1 %v1777_v14  ;;  %v1858_v26 = vld [vmem:[%s2545_s2 + $0x10] sm:$0xff]  ;;  %2602 = vst [vmem:[#allocation10_spill] sm:$0xff] %v1864_v27  ;;  %2603 = vst [vmem:[#allocation11_spill] sm:$0xff] %v1872_v28  ;;  %v1877_v29 = vld [vmem:[%s2546_s0 + $0x38] sm:$0xff] }
   0xc   :  { %1336 = vmatprep.subr.mxu0 %v1738_v8  ;;  %1387 = vmatpush3.msra.mxu1 %v1777_v14  ;;  %2601 = vst [vmem:[#allocation9_spill] sm:$0xff] %v1858_v26  ;;  %v1885_v30 = vld [vmem:[%s2547_s1 + $0x40] sm:$0xff]  ;;  %v1899_v32 = vld [vmem:[%s2547_s1 + $0x38] sm:$0xff]  ;;  %v1915_v34 = vld [vmem:[%s2547_s1 + $0x30] sm:$0xff] }
   0xd   :  { %1337 = vmatpush3.msra.mxu0 %v1738_v8  ;;  %1388 = vmatprep.subr.mxu1 %v1803_v18  ;;  %2604 = vst [vmem:[#allocation12_spill] sm:$0xff] %v1885_v30  ;;  %v1891_v31 = vld [vmem:[%s2545_s2] sm:$0xff]  ;;  %2606 = vst [vmem:[#allocation14_spill] sm:$0xff] %v1899_v32  ;;  %v1923_v35 = vld [vmem:[%s2546_s0 + $0x48] sm:$0xff] }
   0xe   :  { %1338 = vmatprep.subr.mxu0 %v1746_v9  ;;  %212 = vxpose.xlu0.b32.cont [4/16] %v1751_v10, 128  ;;  %2605 = vst [vmem:[#allocation13_spill] sm:$0xff] %v1891_v31  ;;  %v1905_v33 = vld [vmem:[%s2546_s0 + $0x40] sm:$0xff]  ;;  %2607 = vst [vmem:[#allocation15_spill] sm:$0xff] %v1915_v34  ;;  %v1930_v36 = vld [vmem:[%s2547_s1 + $0x28] sm:$0xff] }
   0xf   :  { %1339 = vmatpush3.msra.mxu0 %v1746_v9  ;;  %1389 = vmatpush3.msra.mxu1 %v1803_v18  ;;  %v1938_v37 = vld [vmem:[%s2547_s1 + $0x20] sm:$0xff]  ;;  %v1944_v38 = vld [vmem:[%s2546_s0 + $0x50] sm:$0xff]  ;;  %v1952_v39 = vld [vmem:[%s2547_s1 + $0x18] sm:$0xff] }
  0x10   :  { %1340 = vmatprep.subr.mxu0 %v1769_v13  ;;  %1390 = vmatprep.subr.mxu1 %v1824_v21  ;;  %2608 = vst [vmem:[#allocation16_spill] sm:$0xff] %v1938_v37  ;;  %v1960_v40 = vld [vmem:[%s2546_s0 + $0x58] sm:$0xff]  ;;  %v1967_v41 = vld [vmem:[%s2547_s1 + $0x10] sm:$0xff]  ;;  %v1975_v42 = vld [vmem:[%s2547_s1 + $0x8] sm:$0xff] }
  0x11   :  { %1341 = vmatpush3.msra.mxu0 %v1769_v13  ;;  %1391 = vmatpush3.msra.mxu1 %v1824_v21  ;;  %v1981_v43 = vld [vmem:[%s2546_s0 + $0x60] sm:$0xff]  ;;  %v1997_v45 = vld [vmem:[%s2546_s0 + $0x68] sm:$0xff]  ;;  %v2008_v46 = vld [vmem:[%s2546_s0 + $0x70] sm:$0xff] }
  0x12   :  { %1342 = vmatprep.subr.mxu0 %v1783_v15  ;;  %213 = vxpose.xlu0.b32.cont [5/16] %v1788_v16, 128  ;;  %v1989_v44 = vld [vmem:[%s2547_s1] sm:$0xff]  ;;  %v2016_v47 = vld [vmem:[%s2546_s0 + $0x78] sm:$0xff] }
  0x13   :  { %1343 = vmatpush3.msra.mxu0 %v1783_v15  ;;  %1392 = vmatprep.subr.mxu1 %v1838_v23 }
  0x14   :  { %1344 = vmatprep.subr.mxu0 %v1797_v17  ;;  %1393 = vmatpush3.msra.mxu1 %v1838_v23 }
  0x15   :  { %1345 = vmatpush3.msra.mxu0 %v1797_v17  ;;  %1394 = vmatprep.subr.mxu1 %v1864_v27 }
  0x16   :  { %1346 = vmatprep.subr.mxu0 %v1811_v19  ;;  %214 = vxpose.xlu0.b32.cont [6/16] %v1816_v20, 128 }
  0x17   :  { %1347 = vmatpush3.msra.mxu0 %v1811_v19  ;;  %1395 = vmatpush3.msra.mxu1 %v1864_v27 }
  0x18   :  { %1348 = vmatprep.subr.mxu0 %v1830_v22  ;;  %1396 = vmatprep.subr.mxu1 %v1885_v30 }
  0x19   :  { %1349 = vmatpush3.msra.mxu0 %v1830_v22  ;;  %1397 = vmatpush3.msra.mxu1 %v1885_v30 }
  0x1a   :  { %1350 = vmatprep.subr.mxu0 %v1844_v24  ;;  %215 = vxpose.xlu0.b32.cont [7/16] %v1849_v25, 128 }
  0x1b   :  { %1351 = vmatpush3.msra.mxu0 %v1844_v24  ;;  %1398 = vmatprep.subr.mxu1 %v1899_v32 }
  0x1c   :  { %1352 = vmatprep.subr.mxu0 %v1858_v26  ;;  %1399 = vmatpush3.msra.mxu1 %v1899_v32 }
  0x1d   :  { %1353 = vmatpush3.msra.mxu0 %v1858_v26  ;;  %1400 = vmatprep.subr.mxu1 %v1915_v34 }
  0x1e   :  { %1354 = vmatprep.subr.mxu0 %v1872_v28  ;;  %216 = vxpose.xlu0.b32.cont [8/16] %v1877_v29, 128 }
  0x1f   :  { %1355 = vmatpush3.msra.mxu0 %v1872_v28  ;;  %1401 = vmatpush3.msra.mxu1 %v1915_v34 }
  0x20   :  { %1356 = vmatprep.subr.mxu0 %v1891_v31  ;;  %1402 = vmatprep.subr.mxu1 %v1930_v36 }
  0x21   :  { %1357 = vmatpush3.msra.mxu0 %v1891_v31  ;;  %1403 = vmatpush3.msra.mxu1 %v1930_v36 }
  0x22   :  { %1359 = vmatmul.mubr.f32.vlgmr.msra.gmra.mxu0 %v1712_v4  ;;  %217 = vxpose.xlu0.b32.cont [9/16] %v1905_v33, 128 }
  0x23   :  { %1361 = vmatprep.mubr.f32.mxu0 %v1731_v7  ;;  %1404 = vmatprep.subr.mxu1 %v1938_v37 }
  0x24   :  { %1405 = vmatpush3.msra.mxu1 %v1938_v37 }
  0x25   :  { %1406 = vmatprep.subr.mxu1 %v1952_v39 }
  0x26   :  { %1362 = vmatmul.mubr.f32.gmra.mxu0 %v1751_v10  ;;  %218 = vxpose.xlu0.b32.cont [10/16] %v1923_v35, 128 }
  0x27   :  { %1364 = vmatprep.mubr.f32.mxu0 %v1788_v16  ;;  %1407 = vmatpush3.msra.mxu1 %v1952_v39 }
  0x28   :  { %1408 = vmatprep.subr.mxu1 %v1967_v41 }
  0x29   :  { %1409 = vmatpush3.msra.mxu1 %v1967_v41 }
  0x2a   :  { %1365 = vmatmul.mubr.f32.gmra.mxu0 %v1816_v20  ;;  %219 = vxpose.xlu0.b32.cont [11/16] %v1944_v38, 128 }
  0x2b   :  { %1367 = vmatprep.mubr.f32.mxu0 %v1849_v25  ;;  %1410 = vmatprep.subr.mxu1 %v1975_v42 }
  0x2c   :  { %1411 = vmatpush3.msra.mxu1 %v1975_v42 }
  0x2d   :  { %1412 = vmatprep.subr.mxu1 %v1989_v44 }
  0x2e   :  { %1368 = vmatmul.mubr.f32.gmra.mxu0 %v1877_v29  ;;  %220 = vxpose.xlu0.b32.cont [12/16] %v1960_v40, 128 }
  0x2f   :  { %1370 = vmatprep.mubr.f32.mxu0 %v1905_v33  ;;  %1413 = vmatpush3.msra.mxu1 %v1989_v44 }
  0x32   :  { %1371 = vmatmul.mubr.f32.gmra.mxu0 %v1923_v35  ;;  %221 = vxpose.xlu0.b32.cont [13/16] %v1981_v43, 128 }
  0x33   :  { %1373 = vmatprep.mubr.f32.mxu0 %v1944_v38 }
  0x36   :  { %1374 = vmatmul.mubr.f32.gmra.mxu0 %v1960_v40  ;;  %222 = vxpose.xlu0.b32.cont [14/16] %v1997_v45, 128 }
  0x37   :  { %1376 = vmatprep.mubr.f32.mxu0 %v1981_v43 }
  0x3a   :  { %1377 = vmatmul.mubr.f32.gmra.mxu0 %v1997_v45  ;;  %223 = vxpose.xlu0.b32.cont [15/16] %v2008_v46, 128 }
  0x3b   :  { %1379 = vmatprep.mubr.f32.mxu0 %v2008_v46 }
  0x3e   :  { %1380 = vmatmul.mubr.f32.gmra.mxu0 %v2016_v47  ;;  %224 = vxpose.xlu0.b32.end [16/16] %v2016_v47, 128 }
  0x3f   :  { %1470 = vmatprep.mubr.f32.mxu0 %v1696_v1 }
  0x7e   :  { %v2021_v48 = vpop.trf.xlu0 }
  0x7f   :  { %1414 = vmatprep.mubr.f32.mxu1 %v2021_v48 }
  0x82   :  { %v2024_v49 = vpop.trf.xlu0 }
  0x83   :  { %2609 = vst [vmem:[#allocation17_spill] sm:$0xff] %v2024_v49  ;;  %1415 = vmatmul.mubr.f32.vlgmr.msra.gmra.mxu1 %v2024_v49 }
  0x86   :  { %v2027_v50 = vpop.trf.xlu0 }
  0x87   :  { %2610 = vst [vmem:[#allocation18_spill] sm:$0xff] %v2027_v50  ;;  %1417 = vmatprep.mubr.f32.mxu1 %v2027_v50 }
  0x8a   :  { %v2030_v51 = vpop.trf.xlu0 }
  0x8b   :  { %2611 = vst [vmem:[#allocation19_spill] sm:$0xff] %v2030_v51  ;;  %1418 = vmatmul.mubr.f32.gmra.mxu1 %v2030_v51 }
  0x8e   :  { %v2033_v52 = vpop.trf.xlu0 }
  0x8f   :  { %2612 = vst [vmem:[#allocation20_spill] sm:$0xff] %v2033_v52  ;;  %1420 = vmatprep.mubr.f32.mxu1 %v2033_v52 }
  0x92   :  { %v2036_v53 = vpop.trf.xlu0 }
  0x93   :  { %2613 = vst [vmem:[#allocation21_spill] sm:$0xff] %v2036_v53  ;;  %1421 = vmatmul.mubr.f32.gmra.mxu1 %v2036_v53 }
  0x96   :  { %v2039_v54 = vpop.trf.xlu0 }
  0x97   :  { %2614 = vst [vmem:[#allocation22_spill] sm:$0xff] %v2039_v54  ;;  %1423 = vmatprep.mubr.f32.mxu1 %v2039_v54 }
  0x9a   :  { %v2042_v55 = vpop.trf.xlu0 }
  0x9b   :  { %2615 = vst [vmem:[#allocation23_spill] sm:$0xff] %v2042_v55  ;;  %1424 = vmatmul.mubr.f32.gmra.mxu1 %v2042_v55 }
  0x9e   :  { %v2045_v56 = vpop.trf.xlu0 }
  0x9f   :  { %2616 = vst [vmem:[#allocation24_spill] sm:$0xff] %v2045_v56  ;;  %1426 = vmatprep.mubr.f32.mxu1 %v2045_v56 }
  0xa2   :  { %v2048_v57 = vpop.trf.xlu0 }
  0xa3   :  { %2617 = vst [vmem:[#allocation25_spill] sm:$0xff] %v2048_v57  ;;  %1427 = vmatmul.mubr.f32.gmra.mxu1 %v2048_v57 }
  0xa6   :  { %v2051_v58 = vpop.trf.xlu0 }
  0xa7   :  { %2618 = vst [vmem:[#allocation26_spill] sm:$0xff] %v2051_v58  ;;  %1429 = vmatprep.mubr.f32.mxu1 %v2051_v58 }
  0xaa   :  { %v2054_v59 = vpop.trf.xlu0 }
  0xab   :  { %2619 = vst [vmem:[#allocation27_spill] sm:$0xff] %v2054_v59  ;;  %1430 = vmatmul.mubr.f32.gmra.mxu1 %v2054_v59 }
  0xae   :  { %v2057_v60 = vpop.trf.xlu0 }
  0xaf   :  { %2620 = vst [vmem:[#allocation28_spill] sm:$0xff] %v2057_v60  ;;  %1432 = vmatprep.mubr.f32.mxu1 %v2057_v60 }
  0xb2   :  { %v2060_v61 = vpop.trf.xlu0 }
  0xb3   :  { %2621 = vst [vmem:[#allocation29_spill] sm:$0xff] %v2060_v61  ;;  %1433 = vmatmul.mubr.f32.gmra.mxu1 %v2060_v61 }
  0xb6   :  { %v2063_v62 = vpop.trf.xlu0 }
  0xb7   :  { %2622 = vst [vmem:[#allocation30_spill] sm:$0xff] %v2063_v62  ;;  %1435 = vmatprep.mubr.f32.mxu1 %v2063_v62 }
  0xba   :  { %v2066_v63 = vpop.trf.xlu0 }
  0xbb   :  { %2623 = vst [vmem:[#allocation31_spill] sm:$0xff] %v2066_v63  ;;  %1436 = vmatmul.mubr.f32.gmra.mxu1 %v2066_v63 }
  0xbc   :  { %1526 = vmatprep.mubr.f32.mxu1 %v2021_v48 }
  0xe2   :  { %v2070_v2 = vpop.f32.mrf.mxu0 }
  0xe4   :  { %v2072_v26 = vpop.f32.mrf.mxu0 }
  0xe6   :  { %v2074_v24 = vpop.f32.mrf.mxu0 }
  0xe8   :  { %v2076_v31 = vpop.f32.mrf.mxu0 }
  0xea   :  { %v2078_v28 = vpop.f32.mrf.mxu0 }
  0xec   :  { %v2080_v12 = vpop.f32.mrf.mxu0 }
  0xee   :  { %v2082_v11 = vpop.f32.mrf.mxu0 }
  0xf0   :  { %v2084_v18 = vpop.f32.mrf.mxu0 }
  0xf1   :  { %2624 = vst [vmem:[#allocation32_spill] sm:$0xff] %v2084_v18 }
  0xf2   :  { %v2086_v14 = vpop.f32.mrf.mxu0 }
  0xf3   :  { %2625 = vst [vmem:[#allocation33_spill] sm:$0xff] %v2086_v14 }
  0xf4   :  { %v2088_v23 = vpop.f32.mrf.mxu0 }
  0xf5   :  { %2626 = vst [vmem:[#allocation34_spill] sm:$0xff] %v2088_v23 }
  0xf6   :  { %v2090_v21 = vpop.f32.mrf.mxu0 }
  0xf7   :  { %2627 = vst [vmem:[#allocation35_spill] sm:$0xff] %v2090_v21 }
  0xf8   :  { %v2092_v30 = vpop.f32.mrf.mxu0 }
  0xf9   :  { %2628 = vst [vmem:[#allocation36_spill] sm:$0xff] %v2092_v30 }
  0xfa   :  { %v2094_v27 = vpop.f32.mrf.mxu0 }
  0xfb   :  { %2629 = vst [vmem:[#allocation37_spill] sm:$0xff] %v2094_v27 }
  0xfc   :  { %v2096_v34 = vpop.f32.mrf.mxu0 }
  0xfd   :  { %2630 = vst [vmem:[#allocation38_spill] sm:$0xff] %v2096_v34 }
  0xfe   :  { %v2098_v32 = vpop.f32.mrf.mxu0 }
  0xff   :  { %2631 = vst [vmem:[#allocation39_spill] sm:$0xff] %v2098_v32  ;;  %1494 = vmatprep.subr.mxu1 %v2098_v32 }
 0x100   :  { %v2101_v37 = vpop.f32.mrf.mxu0  ;;  %1495 = vmatpush3.msra.mxu1 %v2098_v32 }
 0x101   :  { %2632 = vst [vmem:[#allocation40_spill] sm:$0xff] %v2101_v37  ;;  %1496 = vmatprep.subr.mxu1 %v2101_v37 }
 0x102   :  { %1497 = vmatpush3.msra.mxu1 %v2101_v37 }
 0x103   :  { %1498 = vmatprep.subr.mxu1 %v2094_v27 }
 0x104   :  { %1499 = vmatpush3.msra.mxu1 %v2094_v27 }
 0x105   :  { %1500 = vmatprep.subr.mxu1 %v2096_v34 }
 0x106   :  { %1501 = vmatpush3.msra.mxu1 %v2096_v34 }
 0x107   :  { %1502 = vmatprep.subr.mxu1 %v2090_v21 }
 0x108   :  { %1503 = vmatpush3.msra.mxu1 %v2090_v21 }
 0x109   :  { %1504 = vmatprep.subr.mxu1 %v2092_v30 }
 0x10a   :  { %1505 = vmatpush3.msra.mxu1 %v2092_v30 }
 0x10b   :  { %1506 = vmatprep.subr.mxu1 %v2086_v14 }
 0x10c   :  { %1507 = vmatpush3.msra.mxu1 %v2086_v14 }
 0x10d   :  { %1508 = vmatprep.subr.mxu1 %v2088_v23 }
 0x10e   :  { %1509 = vmatpush3.msra.mxu1 %v2088_v23 }
 0x10f   :  { %1510 = vmatprep.subr.mxu1 %v2082_v11 }
 0x110   :  { %1511 = vmatpush3.msra.mxu1 %v2082_v11 }
 0x111   :  { %1512 = vmatprep.subr.mxu1 %v2084_v18 }
 0x112   :  { %1513 = vmatpush3.msra.mxu1 %v2084_v18 }
 0x113   :  { %1514 = vmatprep.subr.mxu1 %v2078_v28 }
 0x114   :  { %1515 = vmatpush3.msra.mxu1 %v2078_v28 }
 0x115   :  { %1516 = vmatprep.subr.mxu1 %v2080_v12 }
 0x116   :  { %1517 = vmatpush3.msra.mxu1 %v2080_v12 }
 0x117   :  { %1518 = vmatprep.subr.mxu1 %v2074_v24 }
 0x118   :  { %1519 = vmatpush3.msra.mxu1 %v2074_v24 }
 0x119   :  { %1520 = vmatprep.subr.mxu1 %v2076_v31 }
 0x11a   :  { %1521 = vmatpush3.msra.mxu1 %v2076_v31 }
 0x11b   :  { %1522 = vmatprep.subr.mxu1 %v2070_v2 }
 0x11c   :  { %1523 = vmatpush3.msra.mxu1 %v2070_v2 }
 0x11d   :  { %1524 = vmatprep.subr.mxu1 %v2072_v26 }
 0x11e   :  { %1525 = vmatpush3.msra.mxu1 %v2072_v26 }
 0x11f   :  { %1527 = vmatmul.mubr.f32.vlgmr.msra.gmra.mxu1 %v2024_v49 }
 0x120   :  { %1529 = vmatprep.mubr.f32.mxu1 %v2027_v50 }
 0x123   :  { %1530 = vmatmul.mubr.f32.gmra.mxu1 %v2030_v51 }
 0x124   :  { %1532 = vmatprep.mubr.f32.mxu1 %v2033_v52 }
 0x127   :  { %1533 = vmatmul.mubr.f32.gmra.mxu1 %v2036_v53 }
 0x128   :  { %1535 = vmatprep.mubr.f32.mxu1 %v2039_v54 }
 0x12b   :  { %1536 = vmatmul.mubr.f32.gmra.mxu1 %v2042_v55 }
 0x12c   :  { %1538 = vmatprep.mubr.f32.mxu1 %v2045_v56 }
 0x12f   :  { %1539 = vmatmul.mubr.f32.gmra.mxu1 %v2048_v57 }
 0x130   :  { %1541 = vmatprep.mubr.f32.mxu1 %v2051_v58 }
 0x133   :  { %1542 = vmatmul.mubr.f32.gmra.mxu1 %v2054_v59 }
 0x134   :  { %1544 = vmatprep.mubr.f32.mxu1 %v2057_v60 }
 0x137   :  { %1545 = vmatmul.mubr.f32.gmra.mxu1 %v2060_v61 }
 0x138   :  { %1547 = vmatprep.mubr.f32.mxu1 %v2063_v62 }
 0x13b   :  { %1548 = vmatmul.mubr.f32.gmra.mxu1 %v2066_v63 }
 0x13c   :  { %1638 = vmatprep.mubr.f32.mxu1 %v2021_v48 }
 0x143   :  { %v2150_v37 = vpop.f32.mrf.mxu1 }
 0x144   :  { %2633 = vst [vmem:[#allocation41_spill] sm:$0xff] %v2150_v37 }
 0x145   :  { %v2152_v55 = vpop.f32.mrf.mxu1 }
 0x146   :  { %2634 = vst [vmem:[#allocation42_spill] sm:$0xff] %v2152_v55 }
 0x14b   :  { %v2154_v56 = vpop.f32.mrf.mxu1 }
 0x14c   :  { %2635 = vst [vmem:[#allocation43_spill] sm:$0xff] %v2154_v56 }
 0x14d   :  { %v2156_v57 = vpop.f32.mrf.mxu1 }
 0x14e   :  { %2636 = vst [vmem:[#allocation44_spill] sm:$0xff] %v2156_v57 }
 0x153   :  { %v2158_v58 = vpop.f32.mrf.mxu1 }
 0x155   :  { %v2160_v59 = vpop.f32.mrf.mxu1 }
 0x156   :  { %v406_v32 = vadd.f32 %v2160_v59, %v1830_v22 }
 0x15b   :  { %v2162_v60 = vpop.f32.mrf.mxu1 }
 0x15d   :  { %v2164_v61 = vpop.f32.mrf.mxu1 }
 0x15e   :  { %v408_v23 = vadd.f32 %v2164_v61, %v1797_v17 }
 0x163   :  { %v2166_v62 = vpop.f32.mrf.mxu1 }
 0x165   :  { %v2168_v63 = vpop.f32.mrf.mxu1 }
 0x16b   :  { %v2170_v48 = vpop.f32.mrf.mxu1 }
 0x16d   :  { %v2172_v54 = vpop.f32.mrf.mxu1 }
 0x173   :  { %v2174_v53 = vpop.f32.mrf.mxu1 }
 0x175   :  { %v2176_v52 = vpop.f32.mrf.mxu1 }
 0x17b   :  { %v2178_v51 = vpop.f32.mrf.mxu1 }
 0x17c   :  { %1438 = vmatprep.subr.mxu0 %v2178_v51 }
 0x17d   :  { %v2181_v50 = vpop.f32.mrf.mxu1  ;;  %1439 = vmatpush3.msra.mxu0 %v2178_v51 }
 0x17e   :  { %2637 = vst [vmem:[#allocation45_spill] sm:$0xff] %v2181_v50  ;;  %1440 = vmatprep.subr.mxu0 %v2181_v50 }
 0x17f   :  { %1441 = vmatpush3.msra.mxu0 %v2181_v50 }
 0x180   :  { %1442 = vmatprep.subr.mxu0 %v2174_v53 }
 0x181   :  { %1443 = vmatpush3.msra.mxu0 %v2174_v53 }
 0x182   :  { %1444 = vmatprep.subr.mxu0 %v2176_v52 }
 0x183   :  { %1445 = vmatpush3.msra.mxu0 %v2176_v52 }
 0x184   :  { %1446 = vmatprep.subr.mxu0 %v2170_v48 }
 0x185   :  { %1447 = vmatpush3.msra.mxu0 %v2170_v48 }
 0x186   :  { %1448 = vmatprep.subr.mxu0 %v2172_v54 }
 0x187   :  { %1449 = vmatpush3.msra.mxu0 %v2172_v54 }
 0x188   :  { %1450 = vmatprep.subr.mxu0 %v2166_v62 }
 0x189   :  { %1451 = vmatpush3.msra.mxu0 %v2166_v62 }
 0x18a   :  { %1452 = vmatprep.subr.mxu0 %v2168_v63 }
 0x18b   :  { %1453 = vmatpush3.msra.mxu0 %v2168_v63 }
 0x18c   :  { %1454 = vmatprep.subr.mxu0 %v2162_v60 }
 0x18d   :  { %1455 = vmatpush3.msra.mxu0 %v2162_v60 }
 0x18e   :  { %1456 = vmatprep.subr.mxu0 %v2164_v61 }
 0x18f   :  { %1457 = vmatpush3.msra.mxu0 %v2164_v61  ;;  %v412_v61 = vadd.f32 %v2172_v54, %v1738_v8 }
 0x190   :  { %1458 = vmatprep.subr.mxu0 %v2158_v58 }
 0x191   :  { %1459 = vmatpush3.msra.mxu0 %v2158_v58 }
 0x192   :  { %1460 = vmatprep.subr.mxu0 %v2160_v59 }
 0x193   :  { %1461 = vmatpush3.msra.mxu0 %v2160_v59 }
 0x194   :  { %1462 = vmatprep.subr.mxu0 %v2154_v56 }
 0x195   :  { %1463 = vmatpush3.msra.mxu0 %v2154_v56 }
 0x196   :  { %1464 = vmatprep.subr.mxu0 %v2156_v57 }
 0x197   :  { %1465 = vmatpush3.msra.mxu0 %v2156_v57 }
 0x198   :  { %1466 = vmatprep.subr.mxu0 %v2150_v37 }
 0x199   :  { %1467 = vmatpush3.msra.mxu0 %v2150_v37  ;;  %v407_v37 = vadd.f32 %v2158_v58, %v1811_v19  ;;  %v411_v19 = vadd.f32 %v2166_v62, %v1746_v9 }
 0x19a   :  { %1468 = vmatprep.subr.mxu0 %v2152_v55 }
 0x19b   :  { %1469 = vmatpush3.msra.mxu0 %v2152_v55 }
 0x19c   :  { %1471 = vmatmul.mubr.f32.vlgmr.msra.gmra.mxu0 %v1712_v4 }
 0x19d   :  { %1473 = vmatprep.mubr.f32.mxu0 %v1731_v7 }
 0x1a0   :  { %1474 = vmatmul.mubr.f32.gmra.mxu0 %v1751_v10 }
 0x1a1   :  { %1476 = vmatprep.mubr.f32.mxu0 %v1788_v16 }
 0x1a4   :  { %1477 = vmatmul.mubr.f32.gmra.mxu0 %v1816_v20 }
 0x1a5   :  { %1479 = vmatprep.mubr.f32.mxu0 %v1849_v25 }
 0x1a8   :  { %1480 = vmatmul.mubr.f32.gmra.mxu0 %v1877_v29 }
 0x1a9   :  { %1482 = vmatprep.mubr.f32.mxu0 %v1905_v33 }
 0x1ac   :  { %1483 = vmatmul.mubr.f32.gmra.mxu0 %v1923_v35 }
 0x1ad   :  { %1485 = vmatprep.mubr.f32.mxu0 %v1944_v38 }
 0x1b0   :  { %1486 = vmatmul.mubr.f32.gmra.mxu0 %v1960_v40 }
 0x1b1   :  { %1488 = vmatprep.mubr.f32.mxu0 %v1981_v43 }
 0x1b4   :  { %1489 = vmatmul.mubr.f32.gmra.mxu0 %v1997_v45 }
 0x1b5   :  { %1491 = vmatprep.mubr.f32.mxu0 %v2008_v46 }
 0x1b8   :  { %1492 = vmatmul.mubr.f32.gmra.mxu0 %v2016_v47 }
 0x1b9   :  { %1582 = vmatprep.mubr.f32.mxu0 %v1696_v1  ;;  %v409_v1 = vadd.f32 %v2162_v60, %v1783_v15 }
 0x1df   :  { %v2230_v50 = vpop.f32.mrf.mxu1 }
 0x1e1   :  { %v2232_v57 = vpop.f32.mrf.mxu1 }
 0x1e3   :  { %v2234_v56 = vpop.f32.mrf.mxu1 }
 0x1e5   :  { %v2236_v55 = vpop.f32.mrf.mxu1 }
 0x1e7   :  { %v1534_v49 = vpop.f32.mrf.mxu1 }
 0x1e8   :  { %v2242_v34 = vadd.f32 %v1534_v49, %v407_v37  ;;  %v410_v37 = vadd.f32 %v2168_v63, %v1769_v13  ;;  %v414_v63 = vadd.f32 %v2176_v52, %v1718_v5  ;;  %v2645_v52 = vld [vmem:[#allocation34_spill] sm:$0xff] }
 0x1e9   :  { %v649_v27 = vpop.f32.mrf.mxu1 }
 0x1ea   :  { %v2246_v30 = vadd.f32 %v649_v27, %v406_v32  ;;  %v413_v32 = vadd.f32 %v2170_v48, %v1726_v6  ;;  %v417_v48 = vadd.f32 %v2178_v51, %v1691_v0  ;;  %v387_v0 = vadd.f32 %v2070_v2, %v1975_v42  ;;  %v2640_v42 = vld [vmem:[#allocation15_spill] sm:$0xff]  ;;  %v2644_v51 = vld [vmem:[#allocation12_spill] sm:$0xff] }
 0x1eb   :  { %v1537_v21 = vpop.f32.mrf.mxu1 }
 0x1ec   :  { %v2250_v14 = vadd.f32 %v1537_v21, %v409_v1 }
 0x1ed   :  { %v659_v18 = vpop.f32.mrf.mxu1 }
 0x1ee   :  { %v2254_v58 = vadd.f32 %v659_v18, %v408_v23  ;;  %v415_v23 = vadd.f32 %v2174_v53, %v1707_v3  ;;  %v394_v53 = vadd.f32 %v2645_v52, %v2644_v51  ;;  %v2663_v52 = vld [vmem:[#allocation24_spill] sm:$0xff] }
 0x1ef   :  { %v1540_v22 = vpop.f32.mrf.mxu1 }
 0x1f0   :  { %v2258_v59 = vadd.f32 %v1540_v22, %v411_v19 }
 0x1f1   :  { %v669_v15 = vpop.f32.mrf.mxu1 }
 0x1f2   :  { %v2262_v60 = vadd.f32 %v669_v15, %v410_v37 }
 0x1f3   :  { %v1543_v17 = vpop.f32.mrf.mxu1 }
 0x1f4   :  { %v2266_v1 = vadd.f32 %v1543_v17, %v413_v32 }
 0x1f5   :  { %v679_v9 = vpop.f32.mrf.mxu1 }
 0x1f6   :  { %v2270_v62 = vadd.f32 %v679_v9, %v412_v61 }
 0x1f7   :  { %v1546_v13 = vpop.f32.mrf.mxu1 }
 0x1f8   :  { %v2274_v19 = vadd.f32 %v1546_v13, %v415_v23  ;;  %v2648_v23 = vld [vmem:[#allocation7_spill] sm:$0xff] }
 0x1f9   :  { %v689_v6 = vpop.f32.mrf.mxu1 }
 0x1fa   :  { %v2278_v37 = vadd.f32 %v689_v6, %v414_v63 }
 0x1fb   :  { %v1549_v8 = vpop.f32.mrf.mxu1 }
 0x1fc   :  { %1550 = vmatprep.subr.mxu0 %v1549_v8  ;;  %v2280_v54 = vadd.f32 %v1549_v8, %v417_v48 }
 0x1fd   :  { %v2282_v32 = vpop.f32.mrf.mxu1  ;;  %1551 = vmatpush3.msra.mxu0 %v1549_v8  ;;  %v2650_v8 = vld [vmem:[#allocation4_spill] sm:$0xff] }
 0x1fe   :  { %1552 = vmatprep.subr.mxu0 %v2282_v32 }
 0x1ff   :  { %1553 = vmatpush3.msra.mxu0 %v2282_v32 }
 0x200   :  { %1554 = vmatprep.subr.mxu0 %v1546_v13 }
 0x201   :  { %1555 = vmatpush3.msra.mxu0 %v1546_v13  ;;  %v2649_v13 = vld [vmem:[#allocation36_spill] sm:$0xff] }
 0x202   :  { %1556 = vmatprep.subr.mxu0 %v689_v6  ;;  %v396_v63 = vadd.f32 %v2649_v13, %v2648_v23 }
 0x203   :  { %1557 = vmatpush3.msra.mxu0 %v689_v6 }
 0x204   :  { %1558 = vmatprep.subr.mxu0 %v1543_v17 }
 0x205   :  { %1559 = vmatpush3.msra.mxu0 %v1543_v17 }
 0x206   :  { %1560 = vmatprep.subr.mxu0 %v679_v9 }
 0x207   :  { %1561 = vmatpush3.msra.mxu0 %v679_v9 }
 0x208   :  { %1562 = vmatprep.subr.mxu0 %v1540_v22 }
 0x209   :  { %1563 = vmatpush3.msra.mxu0 %v1540_v22  ;;  %v2646_v22 = vld [vmem:[#allocation6_spill] sm:$0xff] }
 0x20a   :  { %1564 = vmatprep.subr.mxu0 %v669_v15 }
 0x20b   :  { %1565 = vmatpush3.msra.mxu0 %v669_v15  ;;  %v2647_v15 = vld [vmem:[#allocation35_spill] sm:$0xff] }
 0x20c   :  { %1566 = vmatprep.subr.mxu0 %v1537_v21  ;;  %v397_v17 = vadd.f32 %v2647_v15, %v2646_v22  ;;  %v2668_v22 = vld [vmem:[#allocation29_spill] sm:$0xff]  ;;  %v2669_v15 = vld [vmem:[#allocation30_spill] sm:$0xff] }
 0x20d   :  { %1567 = vmatpush3.msra.mxu0 %v1537_v21 }
 0x20e   :  { %1568 = vmatprep.subr.mxu0 %v659_v18 }
 0x20f   :  { %1569 = vmatpush3.msra.mxu0 %v659_v18 }
 0x210   :  { %1570 = vmatprep.subr.mxu0 %v1534_v49 }
 0x211   :  { %1571 = vmatpush3.msra.mxu0 %v1534_v49 }
 0x212   :  { %1572 = vmatprep.subr.mxu0 %v649_v27 }
 0x213   :  { %1573 = vmatpush3.msra.mxu0 %v649_v27 }
 0x214   :  { %1574 = vmatprep.subr.mxu0 %v2234_v56 }
 0x215   :  { %1575 = vmatpush3.msra.mxu0 %v2234_v56 }
 0x216   :  { %1576 = vmatprep.subr.mxu0 %v2236_v55 }
 0x217   :  { %1577 = vmatpush3.msra.mxu0 %v2236_v55 }
 0x218   :  { %1578 = vmatprep.subr.mxu0 %v2230_v50 }
 0x219   :  { %1579 = vmatpush3.msra.mxu0 %v2230_v50 }
 0x21a   :  { %1580 = vmatprep.subr.mxu0 %v2232_v57 }
 0x21b   :  { %1581 = vmatpush3.msra.mxu0 %v2232_v57 }
 0x21c   :  { %1583 = vmatmul.mubr.f32.vlgmr.msra.gmra.mxu0 %v1712_v4  ;;  %v386_v4 = vadd.f32 %v2072_v26, %v1989_v44  ;;  %v391_v26 = vadd.f32 %v2078_v28, %v1930_v36  ;;  %v2642_v36 = vld [vmem:[#allocation10_spill] sm:$0xff] }
 0x21d   :  { %1585 = vmatprep.mubr.f32.mxu0 %v1731_v7 }
 0x220   :  { %1586 = vmatmul.mubr.f32.gmra.mxu0 %v1751_v10  ;;  %v389_v10 = vadd.f32 %v2074_v24, %v1952_v39  ;;  %v2639_v39 = vld [vmem:[#allocation14_spill] sm:$0xff] }
 0x221   :  { %1588 = vmatprep.mubr.f32.mxu0 %v1788_v16 }
 0x224   :  { %1589 = vmatmul.mubr.f32.gmra.mxu0 %v1816_v20  ;;  %v388_v20 = vadd.f32 %v2076_v31, %v1967_v41 }
 0x225   :  { %1591 = vmatprep.mubr.f32.mxu0 %v1849_v25 }
 0x228   :  { %1592 = vmatmul.mubr.f32.gmra.mxu0 %v1877_v29 }
 0x229   :  { %1594 = vmatprep.mubr.f32.mxu0 %v1905_v33  ;;  %v2638_v33 = vld [vmem:[#allocation16_spill] sm:$0xff] }
 0x22a   :  { %v390_v24 = vadd.f32 %v2080_v12, %v2638_v33  ;;  %v2653_v33 = vld [vmem:[#allocation38_spill] sm:$0xff] }
 0x22c   :  { %1595 = vmatmul.mubr.f32.gmra.mxu0 %v1923_v35 }
 0x22d   :  { %1597 = vmatprep.mubr.f32.mxu0 %v1944_v38 }
 0x230   :  { %1598 = vmatmul.mubr.f32.gmra.mxu0 %v1960_v40  ;;  %v393_v40 = vadd.f32 %v2082_v11, %v2639_v39 }
 0x231   :  { %1600 = vmatprep.mubr.f32.mxu0 %v1981_v43  ;;  %v2641_v43 = vld [vmem:[#allocation32_spill] sm:$0xff] }
 0x232   :  { %v392_v44 = vadd.f32 %v2641_v43, %v2640_v42  ;;  %v2654_v42 = vld [vmem:[#allocation2_spill] sm:$0xff]  ;;  %v2655_v43 = vld [vmem:[#allocation39_spill] sm:$0xff] }
 0x234   :  { %1601 = vmatmul.mubr.f32.gmra.mxu0 %v1997_v45 }
 0x235   :  { %1603 = vmatprep.mubr.f32.mxu0 %v2008_v46  ;;  %v2643_v46 = vld [vmem:[#allocation33_spill] sm:$0xff] }
 0x238   :  { %1604 = vmatmul.mubr.f32.gmra.mxu0 %v2016_v47  ;;  %v395_v47 = vadd.f32 %v2643_v46, %v2642_v36 }
 0x25c   :  { %v2311_v3 = vpop.f32.mrf.mxu0 }
 0x25d   :  { %v2316_v5 = vadd.f32 %v2311_v3, %v387_v0  ;;  %v2651_v0 = vld [vmem:[#allocation37_spill] sm:$0xff] }
 0x25e   :  { %v2318_v7 = vpop.f32.mrf.mxu0 }
 0x25f   :  { %v2323_v16 = vadd.f32 %v2318_v7, %v386_v4  ;;  %v399_v4 = vadd.f32 %v2651_v0, %v2650_v8 }
 0x260   :  { %v2325_v18 = vpop.f32.mrf.mxu0 }
 0x261   :  { %v2330_v21 = vadd.f32 %v2325_v18, %v389_v10 }
 0x262   :  { %v494_v25 = vpop.f32.mrf.mxu0 }
 0x263   :  { %v2334_v27 = vadd.f32 %v494_v25, %v388_v20 }
 0x264   :  { %v1478_v29 = vpop.f32.mrf.mxu0 }
 0x265   :  { %v2338_v35 = vadd.f32 %v1478_v29, %v391_v26  ;;  %v2652_v26 = vld [vmem:[#allocation5_spill] sm:$0xff] }
 0x266   :  { %v504_v38 = vpop.f32.mrf.mxu0 }
 0x267   :  { %v2342_v31 = vadd.f32 %v504_v38, %v390_v24  ;;  %v398_v24 = vadd.f32 %v2653_v33, %v2652_v26 }
 0x268   :  { %v1481_v41 = vpop.f32.mrf.mxu0 }
 0x269   :  { %v2346_v45 = vadd.f32 %v1481_v41, %v393_v40 }
 0x26a   :  { %v514_v28 = vpop.f32.mrf.mxu0 }
 0x26b   :  { %v2350_v49 = vadd.f32 %v514_v28, %v392_v44  ;;  %v401_v44 = vadd.f32 %v2655_v43, %v2654_v42 }
 0x26c   :  { %v1484_v12 = vpop.f32.mrf.mxu0 }
 0x26d   :  { %v2354_v2 = vadd.f32 %v1484_v12, %v395_v47 }
 0x26e   :  { %v524_v11 = vpop.f32.mrf.mxu0 }
 0x26f   :  { %v2358_v61 = vadd.f32 %v524_v11, %v394_v53  ;;  %v2665_v53 = vld [vmem:[#allocation26_spill] sm:$0xff] }
 0x270   :  { %v1487_v9 = vpop.f32.mrf.mxu0 }
 0x271   :  { %v2362_v6 = vadd.f32 %v1487_v9, %v397_v17  ;;  %v2670_v17 = vld [vmem:[#allocation31_spill] sm:$0xff] }
 0x272   :  { %v534_v48 = vpop.f32.mrf.mxu0 }
 0x273   :  { %v2366_v10 = vadd.f32 %v534_v48, %v396_v63 }
 0x274   :  { %v1490_v20 = vpop.f32.mrf.mxu0 }
 0x275   :  { %v2370_v39 = vadd.f32 %v1490_v20, %v399_v4 }
 0x276   :  { %v544_v40 = vpop.f32.mrf.mxu0 }
 0x277   :  { %v2374_v36 = vadd.f32 %v544_v40, %v398_v24 }
 0x278   :  { %v1493_v46 = vpop.f32.mrf.mxu0 }
 0x279   :  { %1606 = vmatprep.subr.mxu1 %v1493_v46  ;;  %v2376_v47 = vadd.f32 %v1493_v46, %v401_v44 }
 0x27a   :  { %v2378_v51 = vpop.f32.mrf.mxu0  ;;  %1607 = vmatpush3.msra.mxu1 %v1493_v46 }
 0x27b   :  { %1608 = vmatprep.subr.mxu1 %v2378_v51 }
 0x27c   :  { %1609 = vmatpush3.msra.mxu1 %v2378_v51 }
 0x27d   :  { %1610 = vmatprep.subr.mxu1 %v1490_v20 }
 0x27e   :  { %1611 = vmatpush3.msra.mxu1 %v1490_v20 }
 0x27f   :  { %1612 = vmatprep.subr.mxu1 %v544_v40 }
 0x280   :  { %1613 = vmatpush3.msra.mxu1 %v544_v40 }
 0x281   :  { %1614 = vmatprep.subr.mxu1 %v1487_v9 }
 0x282   :  { %1615 = vmatpush3.msra.mxu1 %v1487_v9 }
 0x283   :  { %1616 = vmatprep.subr.mxu1 %v534_v48 }
 0x284   :  { %1617 = vmatpush3.msra.mxu1 %v534_v48 }
 0x285   :  { %1618 = vmatprep.subr.mxu1 %v1484_v12 }
 0x286   :  { %1619 = vmatpush3.msra.mxu1 %v1484_v12  ;;  %v2660_v12 = vld [vmem:[#allocation21_spill] sm:$0xff] }
 0x287   :  { %1620 = vmatprep.subr.mxu1 %v524_v11 }
 0x288   :  { %1621 = vmatpush3.msra.mxu1 %v524_v11  ;;  %v2667_v11 = vld [vmem:[#allocation28_spill] sm:$0xff] }
 0x289   :  { %1622 = vmatprep.subr.mxu1 %v1481_v41 }
 0x28a   :  { %1623 = vmatpush3.msra.mxu1 %v1481_v41  ;;  %v2656_v41 = vld [vmem:[#allocation17_spill] sm:$0xff] }
 0x28b   :  { %1624 = vmatprep.subr.mxu1 %v514_v28 }
 0x28c   :  { %1625 = vmatpush3.msra.mxu1 %v514_v28  ;;  %v2657_v28 = vld [vmem:[#allocation18_spill] sm:$0xff] }
 0x28d   :  { %1626 = vmatprep.subr.mxu1 %v1478_v29 }
 0x28e   :  { %1627 = vmatpush3.msra.mxu1 %v1478_v29  ;;  %v2658_v29 = vld [vmem:[#allocation19_spill] sm:$0xff] }
 0x28f   :  { %1628 = vmatprep.subr.mxu1 %v504_v38 }
 0x290   :  { %1629 = vmatpush3.msra.mxu1 %v504_v38  ;;  %v2659_v38 = vld [vmem:[#allocation20_spill] sm:$0xff] }
 0x291   :  { %1630 = vmatprep.subr.mxu1 %v2325_v18 }
 0x292   :  { %1631 = vmatpush3.msra.mxu1 %v2325_v18  ;;  %v2661_v18 = vld [vmem:[#allocation22_spill] sm:$0xff] }
 0x293   :  { %1632 = vmatprep.subr.mxu1 %v494_v25 }
 0x294   :  { %1633 = vmatpush3.msra.mxu1 %v494_v25  ;;  %v2662_v25 = vld [vmem:[#allocation23_spill] sm:$0xff] }
 0x295   :  { %1634 = vmatprep.subr.mxu1 %v2311_v3 }
 0x296   :  { %1635 = vmatpush3.msra.mxu1 %v2311_v3  ;;  %v2664_v3 = vld [vmem:[#allocation25_spill] sm:$0xff] }
 0x297   :  { %1636 = vmatprep.subr.mxu1 %v2318_v7 }
 0x298   :  { %1637 = vmatpush3.msra.mxu1 %v2318_v7  ;;  %v2666_v7 = vld [vmem:[#allocation27_spill] sm:$0xff] }
 0x299   :  { %1639 = vmatmul.mubr.f32.vlgmr.msra.gmra.mxu1 %v2656_v41 }
 0x29a   :  { %1641 = vmatprep.mubr.f32.mxu1 %v2657_v28 }
 0x29d   :  { %1642 = vmatmul.mubr.f32.gmra.mxu1 %v2658_v29 }
 0x29e   :  { %1644 = vmatprep.mubr.f32.mxu1 %v2659_v38 }
 0x2a1   :  { %1645 = vmatmul.mubr.f32.gmra.mxu1 %v2660_v12 }
 0x2a2   :  { %1647 = vmatprep.mubr.f32.mxu1 %v2661_v18 }
 0x2a5   :  { %1648 = vmatmul.mubr.f32.gmra.mxu1 %v2662_v25 }
 0x2a6   :  { %1650 = vmatprep.mubr.f32.mxu1 %v2663_v52 }
 0x2a9   :  { %1651 = vmatmul.mubr.f32.gmra.mxu1 %v2664_v3 }
 0x2aa   :  { %1653 = vmatprep.mubr.f32.mxu1 %v2665_v53 }
 0x2ad   :  { %1654 = vmatmul.mubr.f32.gmra.mxu1 %v2666_v7 }
 0x2ae   :  { %1656 = vmatprep.mubr.f32.mxu1 %v2667_v11 }
 0x2b1   :  { %1657 = vmatmul.mubr.f32.gmra.mxu1 %v2668_v22  ;;  %v2671_v22 = vld [vmem:[#allocation3_spill] sm:$0xff] }
 0x2b2   :  { %1659 = vmatprep.mubr.f32.mxu1 %v2669_v15  ;;  %v2672_v15 = vld [vmem:[#allocation40_spill] sm:$0xff] }
 0x2b5   :  { %1660 = vmatmul.mubr.f32.gmra.mxu1 %v2670_v17 }
 0x2dc   :  { %v1584_v9 = vpop.f32.mrf.mxu0 }
 0x2dd   :  { %v1031_v23 = vadd.f32 %v1584_v9, %v2316_v5 }
 0x2de   :  { %v806_v13 = vpop.f32.mrf.mxu0 }
 0x2df   :  { %v1063_v63 = vmul.f32 0.25, %v1031_v23  ;;  %v1030_v48 = vadd.f32 %v806_v13, %v2323_v16 }
 0x2e0   :  { %v1587_v8 = vpop.f32.mrf.mxu0 }
 0x2e1   :  { %1079 = vst [vmem:[%s2548_s3 + $0x8] sm:$0xff] %v1063_v63  ;;  %v1062_v0 = vmul.f32 0.25, %v1030_v48  ;;  %v1033_v4 = vadd.f32 %v1587_v8, %v2330_v21 }
 0x2e2   :  { %v816_v20 = vpop.f32.mrf.mxu0 }
 0x2e3   :  { %1078 = vst [vmem:[%s2548_s3] sm:$0xff] %v1062_v0  ;;  %v1065_v26 = vmul.f32 0.25, %v1033_v4  ;;  %v1032_v5 = vadd.f32 %v816_v20, %v2334_v27  ;;  %v2673_v0 = vld [vmem:[#allocation11_spill] sm:$0xff]  ;;  %v2676_v20 = vld [vmem:[#allocation42_spill] sm:$0xff] }
 0x2e4   :  { %v1590_v33 = vpop.f32.mrf.mxu0 }
 0x2e5   :  { %1081 = vst [vmem:[%s2548_s3 + $0x18] sm:$0xff] %v1065_v26  ;;  %v1064_v16 = vmul.f32 0.25, %v1032_v5  ;;  %v1035_v24 = vadd.f32 %v1590_v33, %v2338_v35 }
 0x2e6   :  { %v826_v40 = vpop.f32.mrf.mxu0 }
 0x2e7   :  { %1080 = vst [vmem:[%s2548_s3 + $0x10] sm:$0xff] %v1064_v16  ;;  %v1067_v21 = vmul.f32 0.25, %v1035_v24  ;;  %v1034_v42 = vadd.f32 %v826_v40, %v2342_v31  ;;  %v2677_v16 = vld [vmem:[#allocation8_spill] sm:$0xff]  ;;  %v2678_v24 = vld [vmem:[#allocation43_spill] sm:$0xff] }
 0x2e8   :  { %v1593_v43 = vpop.f32.mrf.mxu0  ;;  %v405_v40 = vadd.f32 %v2678_v24, %v2677_v16 }
 0x2e9   :  { %1083 = vst [vmem:[%s2548_s3 + $0x28] sm:$0xff] %v1067_v21  ;;  %v1066_v27 = vmul.f32 0.25, %v1034_v42  ;;  %v1037_v44 = vadd.f32 %v1593_v43, %v2346_v45 }
 0x2ea   :  { %v836_v46 = vpop.f32.mrf.mxu0 }
 0x2eb   :  { %1082 = vst [vmem:[%s2548_s3 + $0x20] sm:$0xff] %v1066_v27  ;;  %v1069_v35 = vmul.f32 0.25, %v1037_v44  ;;  %v1036_v41 = vadd.f32 %v836_v46, %v2350_v49  ;;  %v2679_v27 = vld [vmem:[#allocation9_spill] sm:$0xff]  ;;  %v2680_v44 = vld [vmem:[#allocation44_spill] sm:$0xff] }
 0x2ec   :  { %v1596_v28 = vpop.f32.mrf.mxu0  ;;  %v404_v46 = vadd.f32 %v2680_v44, %v2679_v27 }
 0x2ed   :  { %1085 = vst [vmem:[%s2548_s3 + $0x38] sm:$0xff] %v1069_v35  ;;  %v1068_v31 = vmul.f32 0.25, %v1036_v41  ;;  %v1039_v29 = vadd.f32 %v1596_v28, %v2354_v2  ;;  %v727_v28 = vadd.f32 %v2234_v56, %v405_v40 }
 0x2ee   :  { %v846_v38 = vpop.f32.mrf.mxu0 }
 0x2ef   :  { %1084 = vst [vmem:[%s2548_s3 + $0x30] sm:$0xff] %v1068_v31  ;;  %v1071_v45 = vmul.f32 0.25, %v1039_v29  ;;  %v1038_v12 = vadd.f32 %v846_v38, %v2358_v61  ;;  %v726_v38 = vadd.f32 %v2236_v55, %v404_v46 }
 0x2f0   :  { %v1599_v18 = vpop.f32.mrf.mxu0 }
 0x2f1   :  { %1087 = vst [vmem:[%s2548_s3 + $0x48] sm:$0xff] %v1071_v45  ;;  %v1070_v49 = vmul.f32 0.25, %v1038_v12  ;;  %v1041_v25 = vadd.f32 %v1599_v18, %v2362_v6  ;;  %v400_v6 = vadd.f32 %v2672_v15, %v2671_v22 }
 0x2f2   :  { %v856_v52 = vpop.f32.mrf.mxu0 }
 0x2f3   :  { %1086 = vst [vmem:[%s2548_s3 + $0x40] sm:$0xff] %v1070_v49  ;;  %v1073_v2 = vmul.f32 0.25, %v1041_v25  ;;  %v1040_v3 = vadd.f32 %v856_v52, %v2366_v10 }
 0x2f4   :  { %v1602_v53 = vpop.f32.mrf.mxu0 }
 0x2f5   :  { %1089 = vst [vmem:[%s2548_s3 + $0x58] sm:$0xff] %v1073_v2  ;;  %v1072_v61 = vmul.f32 0.25, %v1040_v3  ;;  %v1043_v7 = vadd.f32 %v1602_v53, %v2370_v39  ;;  %v722_v39 = vadd.f32 %v2378_v51, %v400_v6  ;;  %v2675_v51 = vld [vmem:[#allocation13_spill] sm:$0xff] }
 0x2f6   :  { %v866_v11 = vpop.f32.mrf.mxu0  ;;  %v402_v26 = vadd.f32 %v2676_v20, %v2675_v51 }
 0x2f7   :  { %1088 = vst [vmem:[%s2548_s3 + $0x50] sm:$0xff] %v1072_v61  ;;  %v1075_v17 = vmul.f32 0.25, %v1043_v7  ;;  %v1042_v9 = vadd.f32 %v866_v11, %v2374_v36 }
 0x2f8   :  { %v1605_v10 = vpop.f32.mrf.mxu0  ;;  %v724_v42 = vadd.f32 %v2232_v57, %v402_v26 }
 0x2f9   :  { %1091 = vst [vmem:[%s2548_s3 + $0x68] sm:$0xff] %v1075_v17  ;;  %v1074_v23 = vmul.f32 0.25, %v1042_v9  ;;  %v1045_v13 = vadd.f32 %v1605_v10, %v2376_v47  ;;  %v2674_v47 = vld [vmem:[#allocation41_spill] sm:$0xff] }
 0x2fa   :  { %v876_v63 = vpop.f32.mrf.mxu0  ;;  %v403_v4 = vadd.f32 %v2674_v47, %v2673_v0 }
 0x2fb   :  { %1090 = vst [vmem:[%s2548_s3 + $0x60] sm:$0xff] %v1074_v23  ;;  %v1077_v48 = vmul.f32 0.25, %v1045_v13  ;;  %v1044_v8 = vadd.f32 %v876_v63, %v722_v39 }
 0x2fc   :  { %v725_v5 = vadd.f32 %v2230_v50, %v403_v4 }
 0x2fd   :  { %1093 = vst [vmem:[%s2548_s3 + $0x78] sm:$0xff] %v1077_v48  ;;  %v1076_v36 = vmul.f32 0.25, %v1044_v8  ;;  %v2681_v48 = vld [vmem:[#allocation45_spill] sm:$0xff] }
 0x2ff   :  { %1092 = vst [vmem:[%s2548_s3 + $0x70] sm:$0xff] %v1076_v36 }
 0x359   :  { %v1640_v33 = vpop.f32.mrf.mxu1 }
 0x35a   :  { %v1047_v21 = vadd.f32 %v1640_v33, %v725_v5 }
 0x35b   :  { %v951_v43 = vpop.f32.mrf.mxu1 }
 0x35c   :  { %v1095_v35 = vmul.f32 0.25, %v1047_v21  ;;  %v1046_v41 = vadd.f32 %v951_v43, %v724_v42 }
 0x35d   :  { %v1643_v31 = vpop.f32.mrf.mxu1 }
 0x35e   :  { %1111 = vst [vmem:[%s2549_s4 + $0x8] sm:$0xff] %v1095_v35  ;;  %v1094_v50 = vmul.f32 0.25, %v1046_v41  ;;  %v1049_v29 = vadd.f32 %v1643_v31, %v727_v28 }
 0x35f   :  { %v961_v45 = vpop.f32.mrf.mxu1 }
 0x360   :  { %1110 = vst [vmem:[%s2549_s4] sm:$0xff] %v1094_v50  ;;  %v1097_v57 = vmul.f32 0.25, %v1049_v29  ;;  %v1048_v12 = vadd.f32 %v961_v45, %v726_v38 }
 0x361   :  { %v1646_v18 = vpop.f32.mrf.mxu1 }
 0x362   :  { %1113 = vst [vmem:[%s2549_s4 + $0x18] sm:$0xff] %v1097_v57  ;;  %v1096_v56 = vmul.f32 0.25, %v1048_v12  ;;  %v1051_v49 = vadd.f32 %v1646_v18, %v2242_v34 }
 0x363   :  { %v971_v25 = vpop.f32.mrf.mxu1 }
 0x364   :  { %1112 = vst [vmem:[%s2549_s4 + $0x10] sm:$0xff] %v1096_v56  ;;  %v1099_v55 = vmul.f32 0.25, %v1051_v49  ;;  %v1050_v52 = vadd.f32 %v971_v25, %v2246_v30 }
 0x365   :  { %v1649_v2 = vpop.f32.mrf.mxu1 }
 0x366   :  { %1115 = vst [vmem:[%s2549_s4 + $0x28] sm:$0xff] %v1099_v55  ;;  %v1098_v3 = vmul.f32 0.25, %v1050_v52  ;;  %v1053_v53 = vadd.f32 %v1649_v2, %v2250_v14 }
 0x367   :  { %v981_v61 = vpop.f32.mrf.mxu1 }
 0x368   :  { %1114 = vst [vmem:[%s2549_s4 + $0x20] sm:$0xff] %v1098_v3  ;;  %v1101_v34 = vmul.f32 0.25, %v1053_v53  ;;  %v1052_v7 = vadd.f32 %v981_v61, %v2254_v58 }
 0x369   :  { %v1652_v11 = vpop.f32.mrf.mxu1 }
 0x36a   :  { %1117 = vst [vmem:[%s2549_s4 + $0x38] sm:$0xff] %v1101_v34  ;;  %v1100_v30 = vmul.f32 0.25, %v1052_v7  ;;  %v1055_v22 = vadd.f32 %v1652_v11, %v2258_v59 }
 0x36b   :  { %v991_v15 = vpop.f32.mrf.mxu1 }
 0x36c   :  { %1116 = vst [vmem:[%s2549_s4 + $0x30] sm:$0xff] %v1100_v30  ;;  %v1103_v14 = vmul.f32 0.25, %v1055_v22  ;;  %v1054_v6 = vadd.f32 %v991_v15, %v2262_v60 }
 0x36d   :  { %v1655_v17 = vpop.f32.mrf.mxu1 }
 0x36e   :  { %1119 = vst [vmem:[%s2549_s4 + $0x48] sm:$0xff] %v1103_v14  ;;  %v1102_v58 = vmul.f32 0.25, %v1054_v6  ;;  %v1057_v9 = vadd.f32 %v1655_v17, %v2266_v1  ;;  %v1662_v1 = vld [vmem:[%s2545_s2 + $0x70] sm:$0xff] }
 0x36f   :  { %v1001_v10 = vpop.f32.mrf.mxu1  ;;  %v416_v8 = vadd.f32 %v1662_v1, %v2681_v48 }
 0x370   :  { %1118 = vst [vmem:[%s2549_s4 + $0x40] sm:$0xff] %v1102_v58  ;;  %v1105_v59 = vmul.f32 0.25, %v1057_v9  ;;  %v1056_v23 = vadd.f32 %v1001_v10, %v2270_v62 }
 0x371   :  { %v1658_v13 = vpop.f32.mrf.mxu1  ;;  %v738_v4 = vadd.f32 %v2282_v32, %v416_v8 }
 0x372   :  { %1121 = vst [vmem:[%s2549_s4 + $0x58] sm:$0xff] %v1105_v59  ;;  %v1104_v60 = vmul.f32 0.25, %v1056_v23  ;;  %v1059_v39 = vadd.f32 %v1658_v13, %v2274_v19 }
 0x373   :  { %v1011_v63 = vpop.f32.mrf.mxu1 }
 0x374   :  { %1120 = vst [vmem:[%s2549_s4 + $0x50] sm:$0xff] %v1104_v60  ;;  %v1107_v62 = vmul.f32 0.25, %v1059_v39  ;;  %v1058_v36 = vadd.f32 %v1011_v63, %v2278_v37 }
 0x375   :  { %v1661_v0 = vpop.f32.mrf.mxu1 }
 0x376   :  { %1123 = vst [vmem:[%s2549_s4 + $0x68] sm:$0xff] %v1107_v62  ;;  %v1106_v19 = vmul.f32 0.25, %v1058_v36  ;;  %v1061_v47 = vadd.f32 %v1661_v0, %v2280_v54 }
 0x377   :  { %v1021_v51 = vpop.f32.mrf.mxu1 }
 0x378   :  { %1122 = vst [vmem:[%s2549_s4 + $0x60] sm:$0xff] %v1106_v19  ;;  %v1109_v20 = vmul.f32 0.25, %v1061_v47  ;;  %v1060_v26 = vadd.f32 %v1021_v51, %v738_v4 }
 0x37a   :  { %1125 = vst [vmem:[%s2549_s4 + $0x78] sm:$0xff] %v1109_v20  ;;  %v1108_v37 = vmul.f32 0.25, %v1060_v26 }
 0x37c   :  { %1124 = vst [vmem:[%s2549_s4 + $0x70] sm:$0xff] %v1108_v37 }

</bundles_post_ra>
